<compile_context>
chip_gen: v7x
topology: tpu7x:2x2x1
jax: 0.10.0
libtpu: 0.0.40
codegen_flags: <defaults>
</compile_context>

<pallas_src>
import functools

import jax
import jax.numpy as jnp
from jax.experimental import pallas as pl
from jax.experimental.pallas import tpu as pltpu

# ---- problem sizes (mirroring the PyTorch script) ---------------------------
batch_size_int = 3
hidden_size_int = 4
input_size_int = 4
num_layer_int = 1
input_str = 'hellohellohellohel'
seq_len_int = len(input_str) // batch_size_int  # 6

SUB, LANE = 8, 128  # one f32 vreg tile


def _tree_sum(terms):
    """Pairwise (balanced-tree) sum of a list of arrays."""
    terms = list(terms)
    while len(terms) > 1:
        nxt = [a + b for a, b in zip(terms[0::2], terms[1::2])]
        if len(terms) % 2:
            nxt.append(terms[-1])
        terms = nxt
    return terms[0]


# ---- kernel ------------------------------------------------------------------
def rnn_kernel(x_ref, wihb_ref, whh_ref, out_ref, *, T, H, I):
    """Single-layer tanh RNN, transposed/lane-dense layout.

    x_ref    : (I, T*LANE)     x_ref[i, t*LANE + b] = x[t, b, i]   (b padded to LANE)
    wihb_ref : (SUB, I+1)      wihb_ref[j, i] = W_ih[j, i] for i<I; column I = b_ih+b_hh
    whh_ref  : (SUB, H)        whh_ref[j, k] = W_hh[j, k]          (rows padded to SUB)
    out_ref  : (T, SUB, LANE)  out_ref[t, j, b] = h_t[b, j]
    """
    NL = T * LANE
    f32 = jnp.float32

    # ---- Phase 1 (time-parallel): input projection + folded bias as I+1
    # rank-1 VPU mul-adds over the whole (SUB, T*LANE) slab.  Exact f32. ------
    terms = []
    for i in range(I):                                      # static unroll, I=4
        w_col = jnp.broadcast_to(wihb_ref[:, i:i + 1], (SUB, NL))   # lane bcast (XLU)
        x_row = jnp.broadcast_to(x_ref[i:i + 1, :], (SUB, NL))      # sublane bcast
        terms.append(w_col * x_row)
    terms.append(jnp.broadcast_to(wihb_ref[:, I:I + 1], (SUB, NL)))  # bias, once
    pre_all = _tree_sum(terms)                              # (SUB, T*LANE)

    # ---- Loop-invariant recurrent-weight lane broadcasts (hoisted, XLU). ----
    wcols = [jnp.broadcast_to(whh_ref[:, k:k + 1], (SUB, LANE)) for k in range(H)]

    # ---- Phase 2 (sequential): h carried in vregs, static unrolled T loop,
    # tree-reassociated rank-1 recurrent contraction on the VPU. --------------
    h = jnp.zeros((SUB, LANE), f32)
    for t in range(T):                                      # T is small & static
        pre_t = pre_all[:, t * LANE:(t + 1) * LANE]         # aligned lane slice
        prods = [wcols[k] * jnp.broadcast_to(h[k:k + 1, :], (SUB, LANE))
                 for k in range(H)]                         # independent rank-1 terms
        h = jnp.tanh(_tree_sum(prods) + pre_t)              # ((p0+p1)+(p2+p3))+pre_t
        out_ref[t] = h                                      # full-vreg, unmasked store


# ---- wrapper -----------------------------------------------------------------
def single_rnn_forward(x, w_ih, w_hh, b_ih, b_hh):
    """x: (T, B, I) f32; weights follow PyTorch nn.RNN parameter shapes:
       w_ih: (H, I), w_hh: (H, H), b_ih: (H,), b_hh: (H,).
       Returns (T*B, H), matching `hidden.view(-1, hidden_size)`."""
    T, B, I = x.shape
    H = w_ih.shape[0]
    assert B <= LANE and H <= SUB and I + 1 <= LANE

    f32 = jnp.float32
    zero = jnp.float32(0)

    # x2[i, t*LANE + b] = x[t, b, i]; pad only batch -> LANE (lane-dense).
    x_t = jnp.transpose(x.astype(f32), (2, 0, 1))                       # (I, T, B)
    x2 = jax.lax.pad(x_t, zero, [(0, 0, 0), (0, 0, 0), (0, LANE - B, 0)])
    x2 = x2.reshape(I, T * LANE)                                        # (I, T*LANE)

    # W_ih with the folded bias as an extra column, rows padded to SUB.
    wihb = jnp.concatenate(
        [w_ih.astype(f32), (b_ih + b_hh).astype(f32)[:, None]], axis=1)  # (H, I+1)
    wihb = jax.lax.pad(wihb, zero, [(0, SUB - H, 0), (0, 0, 0)])         # (SUB, I+1)

    # W_hh, rows padded to SUB (lane broadcast happens inside the kernel).
    whh_p = jax.lax.pad(w_hh.astype(f32), zero, [(0, SUB - H, 0), (0, 0, 0)])  # (SUB, H)

    kernel = functools.partial(rnn_kernel, T=T, H=H, I=I)
    # Whole problem is VMEM-resident (< 64 KiB) -> no grid.
    # For large T: grid over T ("arbitrary", Buffered(2) on x/out BlockSpecs);
    # for B > 128: leading "parallel" batch axis (uses v7x's second TensorCore).
    outT = pl.pallas_call(
        kernel,
        out_shape=jax.ShapeDtypeStruct((T, SUB, LANE), f32),
        in_specs=[
            pl.BlockSpec(memory_space=pltpu.MemorySpace.VMEM),  # x2
            pl.BlockSpec(memory_space=pltpu.MemorySpace.VMEM),  # W_ih | bias
            pl.BlockSpec(memory_space=pltpu.MemorySpace.VMEM),  # W_hh
        ],
        out_specs=pl.BlockSpec(memory_space=pltpu.MemorySpace.VMEM),
    )(x2, wihb, whh_p)

    # Strip padding: outT[t, j, b] -> (T, B, H) -> (T*B, H)
    out = jnp.transpose(outT[:, :H, :B], (0, 2, 1))
    return out.reshape(-1, H)


# ---- driver ------------------------------------------------------------------
if __name__ == "__main__":
    key = jax.random.PRNGKey(0)
    k_x, k_wih, k_whh, k_bih, k_bhh = jax.random.split(key, 5)

    T, B, I, H = seq_len_int, batch_size_int, input_size_int, hidden_size_int

    # deterministic parameter init, PyTorch-style uniform(-1/sqrt(H), 1/sqrt(H))
    bound = 1.0 / (H ** 0.5)
    w_ih = jax.random.uniform(k_wih, (H, I), jnp.float32, -bound, bound)
    w_hh = jax.random.uniform(k_whh, (H, H), jnp.float32, -bound, bound)
    b_ih = jax.random.uniform(k_bih, (H,), jnp.float32, -bound, bound)
    b_hh = jax.random.uniform(k_bhh, (H,), jnp.float32, -bound, bound)

    # input sequence (seq_len, batch, input_size) — nn.RNN default layout
    x = jax.random.normal(k_x, (T, B, I), jnp.float32)

    out = single_rnn_forward(x, w_ih, w_hh, b_ih, b_hh)
    out = jax.block_until_ready(out)

    # pure-JAX reference (same recurrence) for a sanity check
    def ref(x, w_ih, w_hh, b_ih, b_hh):
        h = jnp.zeros((B, H), jnp.float32)
        outs = []
        hi = jax.lax.Precision.HIGHEST
        for t in range(T):
            h = jnp.tanh(jnp.dot(x[t], w_ih.T, precision=hi) + b_ih
                         + jnp.dot(h, w_hh.T, precision=hi) + b_hh)
            outs.append(h)
        return jnp.stack(outs).reshape(-1, H)

    expected = ref(x, w_ih, w_hh, b_ih, b_hh)
    assert out.shape == (T * B, H), out.shape
    assert jnp.allclose(out, expected, atol=2e-5, rtol=2e-5)

    print("KERNEL_OK")
</pallas_src>

<mosaic_0001>
module attributes {stable_mosaic.version = 11 : i64} {
  func.func @rnn_kernel(%arg0: memref<4x768xf32, #tpu.memory_space<vmem>>, %arg1: memref<8x5xf32, #tpu.memory_space<vmem>>, %arg2: memref<8x4xf32, #tpu.memory_space<vmem>>, %arg3: memref<6x8x128xf32, #tpu.memory_space<vmem>>) attributes {dimension_semantics = [], scalar_prefetch = 0 : i64, scratch_operands = 0 : i64, tpu.core_type = #tpu.core_type<tc>} {
    %c0 = arith.constant 0 : index
    %c0_0 = arith.constant 0 : index
    %0 = vector.load %arg1[%c0, %c0_0] : memref<8x5xf32, #tpu.memory_space<vmem>>, vector<8x1xf32>
    %1 = vector.shape_cast %0 : vector<8x1xf32> to vector<8x1xf32>
    %2 = vector.broadcast %1 : vector<8x1xf32> to vector<8x768xf32>
    %c0_1 = arith.constant 0 : index
    %c0_2 = arith.constant 0 : index
    %3 = vector.load %arg0[%c0_1, %c0_2] : memref<4x768xf32, #tpu.memory_space<vmem>>, vector<1x768xf32>
    %4 = vector.shape_cast %3 : vector<1x768xf32> to vector<1x768xf32>
    %5 = vector.broadcast %4 : vector<1x768xf32> to vector<8x768xf32>
    %6 = arith.mulf %2, %5 : vector<8x768xf32>
    %c0_3 = arith.constant 0 : index
    %c1 = arith.constant 1 : index
    %7 = vector.load %arg1[%c0_3, %c1] : memref<8x5xf32, #tpu.memory_space<vmem>>, vector<8x1xf32>
    %8 = vector.shape_cast %7 : vector<8x1xf32> to vector<8x1xf32>
    %9 = vector.broadcast %8 : vector<8x1xf32> to vector<8x768xf32>
    %c1_4 = arith.constant 1 : index
    %c0_5 = arith.constant 0 : index
    %10 = vector.load %arg0[%c1_4, %c0_5] : memref<4x768xf32, #tpu.memory_space<vmem>>, vector<1x768xf32>
    %11 = vector.shape_cast %10 : vector<1x768xf32> to vector<1x768xf32>
    %12 = vector.broadcast %11 : vector<1x768xf32> to vector<8x768xf32>
    %13 = arith.mulf %9, %12 : vector<8x768xf32>
    %c0_6 = arith.constant 0 : index
    %c2 = arith.constant 2 : index
    %14 = vector.load %arg1[%c0_6, %c2] : memref<8x5xf32, #tpu.memory_space<vmem>>, vector<8x1xf32>
    %15 = vector.shape_cast %14 : vector<8x1xf32> to vector<8x1xf32>
    %16 = vector.broadcast %15 : vector<8x1xf32> to vector<8x768xf32>
    %c2_7 = arith.constant 2 : index
    %c0_8 = arith.constant 0 : index
    %17 = vector.load %arg0[%c2_7, %c0_8] : memref<4x768xf32, #tpu.memory_space<vmem>>, vector<1x768xf32>
    %18 = vector.shape_cast %17 : vector<1x768xf32> to vector<1x768xf32>
    %19 = vector.broadcast %18 : vector<1x768xf32> to vector<8x768xf32>
    %20 = arith.mulf %16, %19 : vector<8x768xf32>
    %c0_9 = arith.constant 0 : index
    %c3 = arith.constant 3 : index
    %21 = vector.load %arg1[%c0_9, %c3] : memref<8x5xf32, #tpu.memory_space<vmem>>, vector<8x1xf32>
    %22 = vector.shape_cast %21 : vector<8x1xf32> to vector<8x1xf32>
    %23 = vector.broadcast %22 : vector<8x1xf32> to vector<8x768xf32>
    %c3_10 = arith.constant 3 : index
    %c0_11 = arith.constant 0 : index
    %24 = vector.load %arg0[%c3_10, %c0_11] : memref<4x768xf32, #tpu.memory_space<vmem>>, vector<1x768xf32>
    %25 = vector.shape_cast %24 : vector<1x768xf32> to vector<1x768xf32>
    %26 = vector.broadcast %25 : vector<1x768xf32> to vector<8x768xf32>
    %27 = arith.mulf %23, %26 : vector<8x768xf32>
    %c0_12 = arith.constant 0 : index
    %c4 = arith.constant 4 : index
    %28 = vector.load %arg1[%c0_12, %c4] : memref<8x5xf32, #tpu.memory_space<vmem>>, vector<8x1xf32>
    %29 = vector.shape_cast %28 : vector<8x1xf32> to vector<8x1xf32>
    %30 = vector.broadcast %29 : vector<8x1xf32> to vector<8x768xf32>
    %31 = arith.addf %6, %13 : vector<8x768xf32>
    %32 = arith.addf %20, %27 : vector<8x768xf32>
    %33 = arith.addf %31, %32 : vector<8x768xf32>
    %34 = arith.addf %33, %30 : vector<8x768xf32>
    %c0_13 = arith.constant 0 : index
    %c0_14 = arith.constant 0 : index
    %35 = vector.load %arg2[%c0_13, %c0_14] : memref<8x4xf32, #tpu.memory_space<vmem>>, vector<8x1xf32>
    %36 = vector.shape_cast %35 : vector<8x1xf32> to vector<8x1xf32>
    %37 = vector.broadcast %36 : vector<8x1xf32> to vector<8x128xf32>
    %c0_15 = arith.constant 0 : index
    %c1_16 = arith.constant 1 : index
    %38 = vector.load %arg2[%c0_15, %c1_16] : memref<8x4xf32, #tpu.memory_space<vmem>>, vector<8x1xf32>
    %39 = vector.shape_cast %38 : vector<8x1xf32> to vector<8x1xf32>
    %40 = vector.broadcast %39 : vector<8x1xf32> to vector<8x128xf32>
    %c0_17 = arith.constant 0 : index
    %c2_18 = arith.constant 2 : index
    %41 = vector.load %arg2[%c0_17, %c2_18] : memref<8x4xf32, #tpu.memory_space<vmem>>, vector<8x1xf32>
    %42 = vector.shape_cast %41 : vector<8x1xf32> to vector<8x1xf32>
    %43 = vector.broadcast %42 : vector<8x1xf32> to vector<8x128xf32>
    %c0_19 = arith.constant 0 : index
    %c3_20 = arith.constant 3 : index
    %44 = vector.load %arg2[%c0_19, %c3_20] : memref<8x4xf32, #tpu.memory_space<vmem>>, vector<8x1xf32>
    %45 = vector.shape_cast %44 : vector<8x1xf32> to vector<8x1xf32>
    %46 = vector.broadcast %45 : vector<8x1xf32> to vector<8x128xf32>
    %cst = arith.constant 0.000000e+00 : f32
    %47 = vector.broadcast %cst : f32 to vector<8x128xf32>
    %48 = vector.extract_strided_slice %34 {offsets = [0, 0], sizes = [8, 128], strides = [1, 1]} : vector<8x768xf32> to vector<8x128xf32>
    %49 = vector.extract_strided_slice %47 {offsets = [0, 0], sizes = [1, 128], strides = [1, 1]} : vector<8x128xf32> to vector<1x128xf32>
    %50 = vector.shape_cast %49 : vector<1x128xf32> to vector<1x128xf32>
    %51 = vector.broadcast %50 : vector<1x128xf32> to vector<8x128xf32>
    %52 = arith.mulf %37, %51 : vector<8x128xf32>
    %53 = vector.extract_strided_slice %47 {offsets = [1, 0], sizes = [1, 128], strides = [1, 1]} : vector<8x128xf32> to vector<1x128xf32>
    %54 = vector.shape_cast %53 : vector<1x128xf32> to vector<1x128xf32>
    %55 = vector.broadcast %54 : vector<1x128xf32> to vector<8x128xf32>
    %56 = arith.mulf %40, %55 : vector<8x128xf32>
    %57 = vector.extract_strided_slice %47 {offsets = [2, 0], sizes = [1, 128], strides = [1, 1]} : vector<8x128xf32> to vector<1x128xf32>
    %58 = vector.shape_cast %57 : vector<1x128xf32> to vector<1x128xf32>
    %59 = vector.broadcast %58 : vector<1x128xf32> to vector<8x128xf32>
    %60 = arith.mulf %43, %59 : vector<8x128xf32>
    %61 = vector.extract_strided_slice %47 {offsets = [3, 0], sizes = [1, 128], strides = [1, 1]} : vector<8x128xf32> to vector<1x128xf32>
    %62 = vector.shape_cast %61 : vector<1x128xf32> to vector<1x128xf32>
    %63 = vector.broadcast %62 : vector<1x128xf32> to vector<8x128xf32>
    %64 = arith.mulf %46, %63 : vector<8x128xf32>
    %65 = arith.addf %52, %56 : vector<8x128xf32>
    %66 = arith.addf %60, %64 : vector<8x128xf32>
    %67 = arith.addf %65, %66 : vector<8x128xf32>
    %68 = arith.addf %67, %48 : vector<8x128xf32>
    %69 = math.tanh %68 : vector<8x128xf32>
    %c0_21 = arith.constant 0 : index
    %c0_22 = arith.constant 0 : index
    %c0_23 = arith.constant 0 : index
    %70 = vector.load %arg3[%c0_21, %c0_22, %c0_23] : memref<6x8x128xf32, #tpu.memory_space<vmem>>, vector<1x8x128xf32>
    %71 = vector.shape_cast %70 : vector<1x8x128xf32> to vector<8x128xf32>
    %72 = vector.shape_cast %69 : vector<8x128xf32> to vector<1x8x128xf32>
    tpu.vector_store %arg3[%c0_21, %c0_22, %c0_23], %72 {strides = array<i32>} : memref<6x8x128xf32, #tpu.memory_space<vmem>>, vector<1x8x128xf32>,
    %73 = vector.extract_strided_slice %34 {offsets = [0, 128], sizes = [8, 128], strides = [1, 1]} : vector<8x768xf32> to vector<8x128xf32>
    %74 = vector.extract_strided_slice %69 {offsets = [0, 0], sizes = [1, 128], strides = [1, 1]} : vector<8x128xf32> to vector<1x128xf32>
    %75 = vector.shape_cast %74 : vector<1x128xf32> to vector<1x128xf32>
    %76 = vector.broadcast %75 : vector<1x128xf32> to vector<8x128xf32>
    %77 = arith.mulf %37, %76 : vector<8x128xf32>
    %78 = vector.extract_strided_slice %69 {offsets = [1, 0], sizes = [1, 128], strides = [1, 1]} : vector<8x128xf32> to vector<1x128xf32>
    %79 = vector.shape_cast %78 : vector<1x128xf32> to vector<1x128xf32>
    %80 = vector.broadcast %79 : vector<1x128xf32> to vector<8x128xf32>
    %81 = arith.mulf %40, %80 : vector<8x128xf32>
    %82 = vector.extract_strided_slice %69 {offsets = [2, 0], sizes = [1, 128], strides = [1, 1]} : vector<8x128xf32> to vector<1x128xf32>
    %83 = vector.shape_cast %82 : vector<1x128xf32> to vector<1x128xf32>
    %84 = vector.broadcast %83 : vector<1x128xf32> to vector<8x128xf32>
    %85 = arith.mulf %43, %84 : vector<8x128xf32>
    %86 = vector.extract_strided_slice %69 {offsets = [3, 0], sizes = [1, 128], strides = [1, 1]} : vector<8x128xf32> to vector<1x128xf32>
    %87 = vector.shape_cast %86 : vector<1x128xf32> to vector<1x128xf32>
    %88 = vector.broadcast %87 : vector<1x128xf32> to vector<8x128xf32>
    %89 = arith.mulf %46, %88 : vector<8x128xf32>
    %90 = arith.addf %77, %81 : vector<8x128xf32>
    %91 = arith.addf %85, %89 : vector<8x128xf32>
    %92 = arith.addf %90, %91 : vector<8x128xf32>
    %93 = arith.addf %92, %73 : vector<8x128xf32>
    %94 = math.tanh %93 : vector<8x128xf32>
    %c1_24 = arith.constant 1 : index
    %c0_25 = arith.constant 0 : index
    %c0_26 = arith.constant 0 : index
    %95 = vector.load %arg3[%c1_24, %c0_25, %c0_26] : memref<6x8x128xf32, #tpu.memory_space<vmem>>, vector<1x8x128xf32>
    %96 = vector.shape_cast %95 : vector<1x8x128xf32> to vector<8x128xf32>
    %97 = vector.shape_cast %94 : vector<8x128xf32> to vector<1x8x128xf32>
    tpu.vector_store %arg3[%c1_24, %c0_25, %c0_26], %97 {strides = array<i32>} : memref<6x8x128xf32, #tpu.memory_space<vmem>>, vector<1x8x128xf32>,
    %98 = vector.extract_strided_slice %34 {offsets = [0, 256], sizes = [8, 128], strides = [1, 1]} : vector<8x768xf32> to vector<8x128xf32>
    %99 = vector.extract_strided_slice %94 {offsets = [0, 0], sizes = [1, 128], strides = [1, 1]} : vector<8x128xf32> to vector<1x128xf32>
    %100 = vector.shape_cast %99 : vector<1x128xf32> to vector<1x128xf32>
    %101 = vector.broadcast %100 : vector<1x128xf32> to vector<8x128xf32>
    %102 = arith.mulf %37, %101 : vector<8x128xf32>
    %103 = vector.extract_strided_slice %94 {offsets = [1, 0], sizes = [1, 128], strides = [1, 1]} : vector<8x128xf32> to vector<1x128xf32>
    %104 = vector.shape_cast %103 : vector<1x128xf32> to vector<1x128xf32>
    %105 = vector.broadcast %104 : vector<1x128xf32> to vector<8x128xf32>
    %106 = arith.mulf %40, %105 : vector<8x128xf32>
    %107 = vector.extract_strided_slice %94 {offsets = [2, 0], sizes = [1, 128], strides = [1, 1]} : vector<8x128xf32> to vector<1x128xf32>
    %108 = vector.shape_cast %107 : vector<1x128xf32> to vector<1x128xf32>
    %109 = vector.broadcast %108 : vector<1x128xf32> to vector<8x128xf32>
    %110 = arith.mulf %43, %109 : vector<8x128xf32>
    %111 = vector.extract_strided_slice %94 {offsets = [3, 0], sizes = [1, 128], strides = [1, 1]} : vector<8x128xf32> to vector<1x128xf32>
    %112 = vector.shape_cast %111 : vector<1x128xf32> to vector<1x128xf32>
    %113 = vector.broadcast %112 : vector<1x128xf32> to vector<8x128xf32>
    %114 = arith.mulf %46, %113 : vector<8x128xf32>
    %115 = arith.addf %102, %106 : vector<8x128xf32>
    %116 = arith.addf %110, %114 : vector<8x128xf32>
    %117 = arith.addf %115, %116 : vector<8x128xf32>
    %118 = arith.addf %117, %98 : vector<8x128xf32>
    %119 = math.tanh %118 : vector<8x128xf32>
    %c2_27 = arith.constant 2 : index
    %c0_28 = arith.constant 0 : index
    %c0_29 = arith.constant 0 : index
    %120 = vector.load %arg3[%c2_27, %c0_28, %c0_29] : memref<6x8x128xf32, #tpu.memory_space<vmem>>, vector<1x8x128xf32>
    %121 = vector.shape_cast %120 : vector<1x8x128xf32> to vector<8x128xf32>
    %122 = vector.shape_cast %119 : vector<8x128xf32> to vector<1x8x128xf32>
    tpu.vector_store %arg3[%c2_27, %c0_28, %c0_29], %122 {strides = array<i32>} : memref<6x8x128xf32, #tpu.memory_space<vmem>>, vector<1x8x128xf32>,
    %123 = vector.extract_strided_slice %34 {offsets = [0, 384], sizes = [8, 128], strides = [1, 1]} : vector<8x768xf32> to vector<8x128xf32>
    %124 = vector.extract_strided_slice %119 {offsets = [0, 0], sizes = [1, 128], strides = [1, 1]} : vector<8x128xf32> to vector<1x128xf32>
    %125 = vector.shape_cast %124 : vector<1x128xf32> to vector<1x128xf32>
    %126 = vector.broadcast %125 : vector<1x128xf32> to vector<8x128xf32>
    %127 = arith.mulf %37, %126 : vector<8x128xf32>
    %128 = vector.extract_strided_slice %119 {offsets = [1, 0], sizes = [1, 128], strides = [1, 1]} : vector<8x128xf32> to vector<1x128xf32>
    %129 = vector.shape_cast %128 : vector<1x128xf32> to vector<1x128xf32>
    %130 = vector.broadcast %129 : vector<1x128xf32> to vector<8x128xf32>
    %131 = arith.mulf %40, %130 : vector<8x128xf32>
    %132 = vector.extract_strided_slice %119 {offsets = [2, 0], sizes = [1, 128], strides = [1, 1]} : vector<8x128xf32> to vector<1x128xf32>
    %133 = vector.shape_cast %132 : vector<1x128xf32> to vector<1x128xf32>
    %134 = vector.broadcast %133 : vector<1x128xf32> to vector<8x128xf32>
    %135 = arith.mulf %43, %134 : vector<8x128xf32>
    %136 = vector.extract_strided_slice %119 {offsets = [3, 0], sizes = [1, 128], strides = [1, 1]} : vector<8x128xf32> to vector<1x128xf32>
    %137 = vector.shape_cast %136 : vector<1x128xf32> to vector<1x128xf32>
    %138 = vector.broadcast %137 : vector<1x128xf32> to vector<8x128xf32>
    %139 = arith.mulf %46, %138 : vector<8x128xf32>
    %140 = arith.addf %127, %131 : vector<8x128xf32>
    %141 = arith.addf %135, %139 : vector<8x128xf32>
    %142 = arith.addf %140, %141 : vector<8x128xf32>
    %143 = arith.addf %142, %123 : vector<8x128xf32>
    %144 = math.tanh %143 : vector<8x128xf32>
    %c3_30 = arith.constant 3 : index
    %c0_31 = arith.constant 0 : index
    %c0_32 = arith.constant 0 : index
    %145 = vector.load %arg3[%c3_30, %c0_31, %c0_32] : memref<6x8x128xf32, #tpu.memory_space<vmem>>, vector<1x8x128xf32>
    %146 = vector.shape_cast %145 : vector<1x8x128xf32> to vector<8x128xf32>
    %147 = vector.shape_cast %144 : vector<8x128xf32> to vector<1x8x128xf32>
    tpu.vector_store %arg3[%c3_30, %c0_31, %c0_32], %147 {strides = array<i32>} : memref<6x8x128xf32, #tpu.memory_space<vmem>>, vector<1x8x128xf32>,
    %148 = vector.extract_strided_slice %34 {offsets = [0, 512], sizes = [8, 128], strides = [1, 1]} : vector<8x768xf32> to vector<8x128xf32>
    %149 = vector.extract_strided_slice %144 {offsets = [0, 0], sizes = [1, 128], strides = [1, 1]} : vector<8x128xf32> to vector<1x128xf32>
    %150 = vector.shape_cast %149 : vector<1x128xf32> to vector<1x128xf32>
    %151 = vector.broadcast %150 : vector<1x128xf32> to vector<8x128xf32>
    %152 = arith.mulf %37, %151 : vector<8x128xf32>
    %153 = vector.extract_strided_slice %144 {offsets = [1, 0], sizes = [1, 128], strides = [1, 1]} : vector<8x128xf32> to vector<1x128xf32>
    %154 = vector.shape_cast %153 : vector<1x128xf32> to vector<1x128xf32>
    %155 = vector.broadcast %154 : vector<1x128xf32> to vector<8x128xf32>
    %156 = arith.mulf %40, %155 : vector<8x128xf32>
    %157 = vector.extract_strided_slice %144 {offsets = [2, 0], sizes = [1, 128], strides = [1, 1]} : vector<8x128xf32> to vector<1x128xf32>
    %158 = vector.shape_cast %157 : vector<1x128xf32> to vector<1x128xf32>
    %159 = vector.broadcast %158 : vector<1x128xf32> to vector<8x128xf32>
    %160 = arith.mulf %43, %159 : vector<8x128xf32>
    %161 = vector.extract_strided_slice %144 {offsets = [3, 0], sizes = [1, 128], strides = [1, 1]} : vector<8x128xf32> to vector<1x128xf32>
    %162 = vector.shape_cast %161 : vector<1x128xf32> to vector<1x128xf32>
    %163 = vector.broadcast %162 : vector<1x128xf32> to vector<8x128xf32>
    %164 = arith.mulf %46, %163 : vector<8x128xf32>
    %165 = arith.addf %152, %156 : vector<8x128xf32>
    %166 = arith.addf %160, %164 : vector<8x128xf32>
    %167 = arith.addf %165, %166 : vector<8x128xf32>
    %168 = arith.addf %167, %148 : vector<8x128xf32>
    %169 = math.tanh %168 : vector<8x128xf32>
    %c4_33 = arith.constant 4 : index
    %c0_34 = arith.constant 0 : index
    %c0_35 = arith.constant 0 : index
    %170 = vector.load %arg3[%c4_33, %c0_34, %c0_35] : memref<6x8x128xf32, #tpu.memory_space<vmem>>, vector<1x8x128xf32>
    %171 = vector.shape_cast %170 : vector<1x8x128xf32> to vector<8x128xf32>
    %172 = vector.shape_cast %169 : vector<8x128xf32> to vector<1x8x128xf32>
    tpu.vector_store %arg3[%c4_33, %c0_34, %c0_35], %172 {strides = array<i32>} : memref<6x8x128xf32, #tpu.memory_space<vmem>>, vector<1x8x128xf32>,
    %173 = vector.extract_strided_slice %34 {offsets = [0, 640], sizes = [8, 128], strides = [1, 1]} : vector<8x768xf32> to vector<8x128xf32>
    %174 = vector.extract_strided_slice %169 {offsets = [0, 0], sizes = [1, 128], strides = [1, 1]} : vector<8x128xf32> to vector<1x128xf32>
    %175 = vector.shape_cast %174 : vector<1x128xf32> to vector<1x128xf32>
    %176 = vector.broadcast %175 : vector<1x128xf32> to vector<8x128xf32>
    %177 = arith.mulf %37, %176 : vector<8x128xf32>
    %178 = vector.extract_strided_slice %169 {offsets = [1, 0], sizes = [1, 128], strides = [1, 1]} : vector<8x128xf32> to vector<1x128xf32>
    %179 = vector.shape_cast %178 : vector<1x128xf32> to vector<1x128xf32>
    %180 = vector.broadcast %179 : vector<1x128xf32> to vector<8x128xf32>
    %181 = arith.mulf %40, %180 : vector<8x128xf32>
    %182 = vector.extract_strided_slice %169 {offsets = [2, 0], sizes = [1, 128], strides = [1, 1]} : vector<8x128xf32> to vector<1x128xf32>
    %183 = vector.shape_cast %182 : vector<1x128xf32> to vector<1x128xf32>
    %184 = vector.broadcast %183 : vector<1x128xf32> to vector<8x128xf32>
    %185 = arith.mulf %43, %184 : vector<8x128xf32>
    %186 = vector.extract_strided_slice %169 {offsets = [3, 0], sizes = [1, 128], strides = [1, 1]} : vector<8x128xf32> to vector<1x128xf32>
    %187 = vector.shape_cast %186 : vector<1x128xf32> to vector<1x128xf32>
    %188 = vector.broadcast %187 : vector<1x128xf32> to vector<8x128xf32>
    %189 = arith.mulf %46, %188 : vector<8x128xf32>
    %190 = arith.addf %177, %181 : vector<8x128xf32>
    %191 = arith.addf %185, %189 : vector<8x128xf32>
    %192 = arith.addf %190, %191 : vector<8x128xf32>
    %193 = arith.addf %192, %173 : vector<8x128xf32>
    %194 = math.tanh %193 : vector<8x128xf32>
    %c5 = arith.constant 5 : index
    %c0_36 = arith.constant 0 : index
    %c0_37 = arith.constant 0 : index
    %195 = vector.load %arg3[%c5, %c0_36, %c0_37] : memref<6x8x128xf32, #tpu.memory_space<vmem>>, vector<1x8x128xf32>
    %196 = vector.shape_cast %195 : vector<1x8x128xf32> to vector<8x128xf32>
    %197 = vector.shape_cast %194 : vector<8x128xf32> to vector<1x8x128xf32>
    tpu.vector_store %arg3[%c5, %c0_36, %c0_37], %197 {strides = array<i32>} : memref<6x8x128xf32, #tpu.memory_space<vmem>>, vector<1x8x128xf32>,
    return
  }
}

</mosaic_0001>

<bundles_post_ra>
// kernel: tpu_custom_call.1
= control target key start
LH: loop header
LB: loop body
LE: loop exit
PB: predicated region body
PF: predicated region fallthrough
CT: control target
= control target key end

     0   :  { %8 = vsyncpa [#allocation3], 0  ;;  %s709_s0 = inlined_call_operand.hbm [shape: f32[4,768], index: 0, kind: input, shape index: {}]   ;;  %s710_s1 = inlined_call_operand.vmem [shape: f32[8,5], index: 1, kind: input, shape index: {}]   ;;  %s711_s2 = inlined_call_operand.vmem [shape: f32[8,4], index: 2, kind: input, shape index: {}]   ;;  %s712_s3 = inlined_call_operand.hbm [shape: f32[6,8,128], index: 3, kind: output, shape index: {}]  }
   0x1   :  { %9 = vsyncpa [#allocation4], 0  ;;  %s485_s12 = smov [#allocation2]   ;;  %s437_s16 = scalar_lea.hbm %s709_s0, 384 }
   0x2   :  { %s16_s13 = sshll.u32 %s485_s12, 4  ;;  %p438_p0 = scmp.ne.s32.totalorder %s709_s0, %s437_s16  ;;  %s17_s13 = int_to_ptr.vmem [resolvable:$true] %s16_s13 }
   0x3   :  { %p441_p1 = scmp.lt.u32.totalorder %s437_s16, %s709_s0 }
   0x5   :  { %p443_p2 = pnand %p441_p1, %p438_p0 }
   0x7   :  { %446 = shalt.err (!%p443_p2)
}
   0x8   :  { %s447_s21 = scalar_lea.vmem %s17_s13, 384  ;;  %p452_p4 = scmp.lt.s32.totalorder %s17_s13, %s17_s13 }
   0x9   :  { %p448_p3 = scmp.ne.s32.totalorder %s17_s13, %s447_s21  ;;  %p453_p5 = scmp.lt.s32.totalorder %s447_s21, %s447_s21 }
   0xb   :  { %p454_p6 = por %p453_p5, %p452_p4 }
   0xd   :  { %p455_p7 = pnand %p454_p6, %p448_p3 }
   0xf   :  { %458 = shalt.err (!%p455_p7)
}
  0x10   :  { %19 = dma.hbm_to_vmem [thread:$0]  %s709_s0, 384, %s17_s13, [#allocation3]  }
  0x11   :  { %481 = dma.done.wait [#allocation3], 384  }
  0x12   :  { %482 = vsyncadd [#allocation3], 4294966912  ;;  %v486_v0 = vmov 2   ;;  %v487_v1 = vmov 0   ;;  %v35_v2 = vlaneseq  ;;  %v27_v6 = vld [vmem:[%s710_s1] sm:$0xff]  ;;  %v488_v15 = vmov 3  }
  0x13   :  { %419 = vset.pattern.permute.xlu1 %v486_v0  ;;  %417 = vset.pattern.permute.xlu0 %v487_v1  ;;  %v533_v7 = vld [vmem:[#allocation2 + $0x2] ss:$4 sm:$0x3f]  ;;  %v535_v8 = vld [vmem:[#allocation2] ss:$4 sm:$0x3f] }
  0x14   :  { %v526_v3 = vshrl.u32 %v35_v2, 7  ;;  %115 = vperm.xlu1 %419, %v27_v6   ;;  %30 = vperm.xlu0 %417, %v27_v6   ;;  %v540_v12 = vld [vmem:[#allocation2 + $0x3] ss:$4 sm:$0x3f]  ;;  %v489_v16 = vmov 1   ;;  %v490_v22 = vmov 4  }
  0x15   :  { %v543_v14 = vld [vmem:[#allocation2 + $0x1] ss:$4 sm:$0x3f] }
  0x16   :  { %v53_v4 = vsub.s32 4, %v526_v3  ;;  %v57_v5 = vsub.s32 5, %v526_v3  ;;  %v228_v19 = vld [vmem:[%s711_s2] sm:$0xff]  ;;  %v553_v23 = vsub.s32 3, %v526_v3  ;;  %v568_v32 = vsub.s32 0, %v526_v3  ;;  %s491_s2 = smov [#allocation5]  }
  0x17   :  { %s396_s26 = sshll.u32 %s491_s2, 4  ;;  %s397_s26 = int_to_ptr.vmem [resolvable:$true] %s396_s26 }
  0x18   :  { %v140_v9 = vrot.slane %v533_v7, %v53_v4  ;;  %v144_v10 = vrot.slane %v533_v7, %v57_v5  ;;  %v54_v11 = vrot.slane %v535_v8, %v53_v4  ;;  %v58_v13 = vrot.slane %v535_v8, %v57_v5  ;;  %420 = vset.pattern.permute.xlu1 %v488_v15  ;;  %s459_s27 = scalar_lea.vmem %s397_s26, 768  ;;  %p464_p9 = scmp.lt.s32.totalorder %s397_s26, %s397_s26 }
  0x19   :  { %418 = vset.pattern.permute.xlu0 %v489_v16  ;;  %v183_v17 = vrot.slane %v540_v12, %v53_v4  ;;  %v187_v18 = vrot.slane %v540_v12, %v57_v5  ;;  %158 = vperm.xlu1 %420, %v27_v6   ;;  %v97_v20 = vrot.slane %v543_v14, %v53_v4  ;;  %p460_p8 = scmp.ne.s32.totalorder %s397_s26, %s459_s27  ;;  %p465_p10 = scmp.lt.s32.totalorder %s459_s27, %s459_s27 }
  0x1a   :  { %72 = vperm.xlu0 %418, %v27_v6   ;;  %v101_v21 = vrot.slane %v543_v14, %v57_v5  ;;  %v179_v28 = vrot.slane %v540_v12, %v553_v23  ;;  %v136_v29 = vrot.slane %v533_v7, %v553_v23  ;;  %v93_v33 = vrot.slane %v543_v14, %v553_v23 }
  0x1b   :  { %v50_v34 = vrot.slane %v535_v8, %v553_v23  ;;  %v167_v37 = vrot.slane %v540_v12, %v568_v32  ;;  %v81_v42 = vrot.slane %v543_v14, %v568_v32  ;;  %v124_v46 = vrot.slane %v533_v7, %v568_v32  ;;  %p466_p11 = por %p465_p10, %p464_p9 }
  0x1c   :  { %v38_v47 = vrot.slane %v535_v8, %v568_v32 }
  0x1d   :  { %421 = vset.pattern.permute.xlu1 %v487_v1  ;;  %p467_p12 = pnand %p466_p11, %p460_p8 }
  0x1e   :  { %235 = vperm.xlu0 %418, %v228_v19   ;;  %231 = vperm.xlu1 %421, %v228_v19  }
  0x22   :  { %423 = vset.pattern.permute.xlu0 %v488_v15  ;;  %422 = vset.pattern.permute.xlu1 %v486_v0 }
  0x23   :  { %243 = vperm.xlu0 %423, %v228_v19   ;;  %239 = vperm.xlu1 %422, %v228_v19  }
  0x27   :  { %424 = vset.pattern.permute.xlu1 %v490_v22  ;;  %v622_v22 = vsub.s32 1, %v526_v3 }
  0x28   :  { %201 = vperm.xlu1 %424, %v27_v6  }
  0x93   :  { %v555_v24 = vpop.permute.xlu1 %115  ;;  %v557_v25 = vpop.permute.xlu0 %30 }
  0x94   :  { %v155_v26 = vmul.f32 %v140_v9, %v555_v24  ;;  %v156_v27 = vmul.f32 %v144_v10, %v555_v24  ;;  %v69_v30 = vmul.f32 %v54_v11, %v557_v25  ;;  %v70_v31 = vmul.f32 %v58_v13, %v557_v25 }
  0x95   :  { %v154_v39 = vmul.f32 %v136_v29, %v555_v24  ;;  %v68_v48 = vmul.f32 %v50_v34, %v557_v25  ;;  %v151_v59 = vmul.f32 %v124_v46, %v555_v24  ;;  %v65_v60 = vmul.f32 %v38_v47, %v557_v25 }
  0x96   :  { %v42_v29 = vrot.slane %v535_v8, %v622_v22 }
  0x98   :  { %v574_v35 = vpop.permute.xlu1 %158  ;;  %v66_v34 = vmul.f32 %v42_v29, %v557_v25 }
  0x99   :  { %v576_v36 = vpop.permute.xlu0 %72  ;;  %v197_v38 = vmul.f32 %v179_v28, %v574_v35  ;;  %v198_v40 = vmul.f32 %v183_v17, %v574_v35  ;;  %v199_v41 = vmul.f32 %v187_v18, %v574_v35  ;;  %v194_v54 = vmul.f32 %v167_v37, %v574_v35 }
  0x9a   :  { %v111_v43 = vmul.f32 %v93_v33, %v576_v36  ;;  %v112_v44 = vmul.f32 %v97_v20, %v576_v36  ;;  %v113_v45 = vmul.f32 %v101_v21, %v576_v36  ;;  %v108_v55 = vmul.f32 %v81_v42, %v576_v36 }
  0x9b   :  { %v213_v49 = vadd.f32 %v197_v38, %v154_v39  ;;  %v214_v52 = vadd.f32 %v198_v40, %v155_v26  ;;  %v215_v53 = vadd.f32 %v199_v41, %v156_v27  ;;  %v210_v6 = vadd.f32 %v194_v54, %v151_v59 }
  0x9c   :  { %v207_v56 = vadd.f32 %v111_v43, %v68_v48  ;;  %v208_v57 = vadd.f32 %v112_v44, %v69_v30  ;;  %v209_v58 = vadd.f32 %v113_v45, %v70_v31  ;;  %v204_v9 = vadd.f32 %v108_v55, %v65_v60 }
  0x9d   :  { %v594_v50 = vpop.permute.xlu0 %235  ;;  %v596_v51 = vpop.permute.xlu1 %231  ;;  %v171_v26 = vrot.slane %v540_v12, %v622_v22  ;;  %v85_v27 = vrot.slane %v543_v14, %v622_v22  ;;  %v128_v28 = vrot.slane %v533_v7, %v622_v22  ;;  %v637_v37 = vsub.s32 2, %v526_v3 }
  0x9e   :  { %v602_v61 = vadd.f32 %v213_v49, %v207_v56  ;;  %v247_v62 = vmul.f32 0.0, %v594_v50  ;;  %v246_v63 = vmul.f32 0.0, %v596_v51  ;;  %v220_v1 = vadd.f32 %v214_v52, %v208_v57 }
  0x9f   :  { %v221_v2 = vadd.f32 %v215_v53, %v209_v58  ;;  %v216_v15 = vadd.f32 %v210_v6, %v204_v9  ;;  %v195_v30 = vmul.f32 %v171_v26, %v574_v35  ;;  %v109_v31 = vmul.f32 %v85_v27, %v576_v36 }
  0xa0   :  { %v250_v11 = vadd.f32 %v247_v62, %v246_v63  ;;  %v152_v33 = vmul.f32 %v128_v28, %v555_v24  ;;  %v175_v56 = vrot.slane %v540_v12, %v637_v37  ;;  %v89_v57 = vrot.slane %v543_v14, %v637_v37 }
  0xa1   :  { %v205_v40 = vadd.f32 %v109_v31, %v66_v34  ;;  %v132_v58 = vrot.slane %v533_v7, %v637_v37  ;;  %v46_v59 = vrot.slane %v535_v8, %v637_v37 }
  0xa2   :  { %v606_v0 = vpop.permute.xlu0 %243  ;;  %v608_v4 = vpop.permute.xlu1 %239  ;;  %v211_v39 = vadd.f32 %v195_v30, %v152_v33  ;;  %v196_v60 = vmul.f32 %v175_v56, %v574_v35  ;;  %v110_v62 = vmul.f32 %v89_v57, %v576_v36 }
  0xa3   :  { %v249_v5 = vmul.f32 0.0, %v606_v0  ;;  %v248_v10 = vmul.f32 0.0, %v608_v4  ;;  %v153_v63 = vmul.f32 %v132_v58, %v555_v24 }
  0xa4   :  { %v217_v48 = vadd.f32 %v211_v39, %v205_v40 }
  0xa5   :  { %v251_v13 = vadd.f32 %v249_v5, %v248_v10  ;;  %v212_v5 = vadd.f32 %v196_v60, %v153_v63 }
  0xa7   :  { %v612_v16 = vpop.permute.xlu1 %201  ;;  %v252_v17 = vadd.f32 %v251_v13, %v250_v11 }
  0xa8   :  { %v222_v18 = vadd.f32 %v216_v15, %v612_v16  ;;  %v616_v19 = vadd.f32 %v220_v1, %v612_v16  ;;  %v619_v20 = vadd.f32 %v221_v2, %v612_v16  ;;  %v223_v53 = vadd.f32 %v217_v48, %v612_v16 }
  0xa9   :  { %v67_v1 = vmul.f32 %v46_v59, %v557_v25  ;;  %v225_v39 = vadd.f32 %v602_v61, %v612_v16 }
  0xaa   :  { %v253_v21 = vadd.f32 %v252_v17, %v222_v18 }
  0xab   :  { %v206_v12 = vadd.f32 %v110_v62, %v67_v1 }
  0xac   :  { %425 = vtanh.f32 %v253_v21 }
  0xad   :  { %v218_v36 = vadd.f32 %v212_v5, %v206_v12 }
  0xaf   :  { %v224_v13 = vadd.f32 %v218_v36, %v612_v16 }
  0xb6   :  { %v426_v38 = vpop.eup %425 }
  0xb7   :  { %v259_v41 = vrot.slane %v426_v38, %v568_v32  ;;  %v264_v42 = vrot.slane %v426_v38, %v622_v22  ;;  %v269_v43 = vrot.slane %v426_v38, %v637_v37  ;;  %v274_v44 = vrot.slane %v426_v38, %v553_v23  ;;  %255 = vst [vmem:[#allocation5] sm:$0xff] %v426_v38 }
  0xb9   :  { %v260_v45 = vmul.f32 %v259_v41, %v596_v51  ;;  %v265_v46 = vmul.f32 %v264_v42, %v594_v50  ;;  %v270_v47 = vmul.f32 %v269_v43, %v608_v4  ;;  %v275_v3 = vmul.f32 %v274_v44, %v606_v0 }
  0xbb   :  { %v276_v49 = vadd.f32 %v265_v46, %v260_v45  ;;  %v277_v52 = vadd.f32 %v275_v3, %v270_v47 }
  0xbd   :  { %v278_v54 = vadd.f32 %v277_v52, %v276_v49 }
  0xbf   :  { %v279_v55 = vadd.f32 %v278_v54, %v223_v53 }
  0xc1   :  { %427 = vtanh.f32 %v279_v55 }
  0xcb   :  { %v428_v2 = vpop.eup %427 }
  0xcc   :  { %v286_v6 = vrot.slane %v428_v2, %v568_v32  ;;  %v291_v14 = vrot.slane %v428_v2, %v622_v22  ;;  %v296_v7 = vrot.slane %v428_v2, %v637_v37  ;;  %v301_v9 = vrot.slane %v428_v2, %v553_v23  ;;  %282 = vst [vmem:[#allocation5 + $0x8] sm:$0xff] %v428_v2 }
  0xce   :  { %v287_v8 = vmul.f32 %v286_v6, %v596_v51  ;;  %v292_v35 = vmul.f32 %v291_v14, %v594_v50  ;;  %v297_v24 = vmul.f32 %v296_v7, %v608_v4  ;;  %v302_v25 = vmul.f32 %v301_v9, %v606_v0 }
  0xd0   :  { %v303_v10 = vadd.f32 %v292_v35, %v287_v8  ;;  %v304_v11 = vadd.f32 %v302_v25, %v297_v24 }
  0xd2   :  { %v305_v15 = vadd.f32 %v304_v11, %v303_v10 }
  0xd4   :  { %v306_v17 = vadd.f32 %v305_v15, %v224_v13 }
  0xd6   :  { %429 = vtanh.f32 %v306_v17 }
  0xe0   :  { %v430_v18 = vpop.eup %429 }
  0xe1   :  { %v313_v21 = vrot.slane %v430_v18, %v568_v32  ;;  %v318_v26 = vrot.slane %v430_v18, %v622_v22  ;;  %v323_v27 = vrot.slane %v430_v18, %v637_v37  ;;  %v328_v28 = vrot.slane %v430_v18, %v553_v23  ;;  %309 = vst [vmem:[#allocation5 + $0x10] sm:$0xff] %v430_v18 }
  0xe3   :  { %v314_v29 = vmul.f32 %v313_v21, %v596_v51  ;;  %v319_v30 = vmul.f32 %v318_v26, %v594_v50  ;;  %v324_v31 = vmul.f32 %v323_v27, %v608_v4  ;;  %v329_v33 = vmul.f32 %v328_v28, %v606_v0 }
  0xe5   :  { %v330_v34 = vadd.f32 %v319_v30, %v314_v29  ;;  %v331_v38 = vadd.f32 %v329_v33, %v324_v31 }
  0xe7   :  { %v332_v40 = vadd.f32 %v331_v38, %v330_v34 }
  0xe9   :  { %v333_v41 = vadd.f32 %v332_v40, %v225_v39 }
  0xeb   :  { %431 = vtanh.f32 %v333_v41 }
  0xf5   :  { %v432_v42 = vpop.eup %431 }
  0xf6   :  { %v340_v43 = vrot.slane %v432_v42, %v568_v32  ;;  %v345_v44 = vrot.slane %v432_v42, %v622_v22  ;;  %v350_v45 = vrot.slane %v432_v42, %v637_v37  ;;  %v355_v46 = vrot.slane %v432_v42, %v553_v23  ;;  %336 = vst [vmem:[#allocation5 + $0x18] sm:$0xff] %v432_v42 }
  0xf8   :  { %v341_v47 = vmul.f32 %v340_v43, %v596_v51  ;;  %v346_v3 = vmul.f32 %v345_v44, %v594_v50  ;;  %v351_v48 = vmul.f32 %v350_v45, %v608_v4  ;;  %v356_v61 = vmul.f32 %v355_v46, %v606_v0 }
  0xfa   :  { %v357_v16 = vadd.f32 %v346_v3, %v341_v47  ;;  %v358_v49 = vadd.f32 %v356_v61, %v351_v48 }
  0xfc   :  { %v359_v52 = vadd.f32 %v358_v49, %v357_v16 }
  0xfe   :  { %v360_v53 = vadd.f32 %v359_v52, %v616_v19 }
 0x100   :  { %433 = vtanh.f32 %v360_v53 }
 0x10a   :  { %v434_v54 = vpop.eup %433 }
 0x10b   :  { %v367_v55 = vrot.slane %v434_v54, %v568_v32  ;;  %v372_v56 = vrot.slane %v434_v54, %v622_v22  ;;  %v377_v57 = vrot.slane %v434_v54, %v637_v37  ;;  %v382_v58 = vrot.slane %v434_v54, %v553_v23  ;;  %363 = vst [vmem:[#allocation5 + $0x20] sm:$0xff] %v434_v54 }
 0x10d   :  { %v368_v59 = vmul.f32 %v367_v55, %v596_v51  ;;  %v373_v60 = vmul.f32 %v372_v56, %v594_v50  ;;  %v378_v62 = vmul.f32 %v377_v57, %v608_v4  ;;  %v383_v63 = vmul.f32 %v382_v58, %v606_v0 }
 0x10f   :  { %v384_v19 = vadd.f32 %v373_v60, %v368_v59  ;;  %v385_v1 = vadd.f32 %v383_v63, %v378_v62 }
 0x111   :  { %v386_v2 = vadd.f32 %v385_v1, %v384_v19 }
 0x113   :  { %v387_v32 = vadd.f32 %v386_v2, %v619_v20 }
 0x115   :  { %435 = vtanh.f32 %v387_v32 }
 0x11f   :  { %v436_v22 = vpop.eup %435 }
 0x120   :  { %390 = vst [vmem:[#allocation5 + $0x28] sm:$0xff] %v436_v22 }
 0x121   :  { %470 = shalt.err (!%p467_p12)
}
 0x122   :  { %s471_s30 = scalar_lea.hbm %s712_s3, 768 }
 0x123   :  { %p472_p13 = scmp.ne.s32.totalorder %s712_s3, %s471_s30  ;;  %p475_p0 = scmp.lt.u32.totalorder %s471_s30, %s712_s3 }
 0x125   :  { %p477_p1 = pnand %p475_p0, %p472_p13 }
 0x127   :  { %480 = shalt.err (!%p477_p1)
}
 0x128   :  { %s492_s8 = smov 128   ;;  %s493_s9 = smov 8  }
 0x129   :  { %402 = dma.vmem_to_hbm [thread:$0]  %s397_s26, 768, %s712_s3, [#allocation4], %s492_s8, %s492_s8, %s493_s9  }
 0x12a   :  { %483 = dma.done.wait [#allocation4], 768  }
 0x12b   :  { %484 = vsyncadd [#allocation4], 4294966528 }
 0x12c   :  { %406 = vsyncpa [#allocation3], 1 }
 0x12d   :  { %407 = vsyncpa [#allocation4], 1 }

</bundles_post_ra>
